<compile_context>
chip_gen: v7x
topology: tpu7x:2x2x1
jax: 0.10.0
libtpu: 0.0.40
codegen_flags: <defaults>
</compile_context>

<pallas_src>
import jax
import jax.numpy as jnp
from jax.experimental import pallas as pl
from jax.experimental.pallas import tpu as pltpu

_MiB = 1024 * 1024


def _round_up(a, b):
    return (a + b - 1) // b * b


def _device_kind():
    try:
        return jax.devices()[0].device_kind.lower()
    except Exception:
        return ""


def _has_int8_mxu(kind):
    """True on generations with a native int8 MXU path (v5*, v6*)."""
    return any(tag in kind for tag in ("v5", "v6"))


def _vmem_cap_bytes(kind):
    # v7x has 64 MiB physical VMEM per core; older gens have 128 MiB.
    if "v7" in kind or kind == "":
        return 48 * _MiB
    return 100 * _MiB


def _pick_divisor_tile(dim_padded, target, step=128):
    """Largest multiple of `step` dividing dim_padded and <= target."""
    t = max(step, (min(target, dim_padded) // step) * step)
    while dim_padded % t != 0:
        t -= step
    return t


# ---------------------------------------------------------------------------
# Pre-pass: dynamic per-row (per-token) quantization of activations.
# ---------------------------------------------------------------------------
def _quantize_act_kernel(x_ref, xq_ref, sx_ref):
    x = x_ref[...].astype(jnp.float32)                          # (rows, Kp)
    absmax = jnp.max(jnp.abs(x), axis=-1, keepdims=True)        # (rows, 1)
    absmax = jnp.where(absmax == 0.0, 1.0, absmax)
    q = jnp.clip(jnp.round(x * (127.0 / absmax)), -127.0, 127.0)
    xq_ref[...] = q.astype(xq_ref.dtype)
    sx_ref[...] = absmax * (1.0 / 127.0)                        # pre-fold 1/127


def _quantize_activations(x2d, rows, xq_dtype, vmem_limit):
    Mp, Kp = x2d.shape
    return pl.pallas_call(
        _quantize_act_kernel,
        out_shape=(jax.ShapeDtypeStruct((Mp, Kp), xq_dtype),
                   jax.ShapeDtypeStruct((Mp, 1), jnp.float32)),
        grid_spec=pltpu.PrefetchScalarGridSpec(
            num_scalar_prefetch=0,
            grid=(Mp // rows,),
            in_specs=[pl.BlockSpec((rows, Kp), lambda i: (i, 0))],
            out_specs=[pl.BlockSpec((rows, Kp), lambda i: (i, 0)),
                       pl.BlockSpec((rows, 1), lambda i: (i, 0))],
        ),
        compiler_params=pltpu.CompilerParams(
            dimension_semantics=("parallel",),
            vmem_limit_bytes=vmem_limit),
    )(x2d)


# ---------------------------------------------------------------------------
# Main kernel: tiled quantized GEMM with dequant + bias epilogue.
# ---------------------------------------------------------------------------
def _make_int8_gemm_kernel(use_int8_mxu):
    def kernel(xq_ref, w_ref, sx_ref, sb_ref, out_ref, acc_ref):
        k = pl.program_id(2)

        @pl.when(k == 0)
        def _():
            acc_ref[...] = jnp.zeros_like(acc_ref)

        if use_int8_mxu:
            # v5e / v6e: native int8 x int8 -> int32 (exact, bnb-equivalent).
            acc_ref[...] += jnp.dot(xq_ref[...], w_ref[...],
                                    preferred_element_type=jnp.int32)
        else:
            # No integer MXU (e.g. v7x): int8 codes are exact in bf16.
            # Operands normally arrive already in bf16 (pre-pass / pre-cast),
            # so no per-step VPU cast is traced in that case.
            xq = xq_ref[...]
            if xq.dtype != jnp.bfloat16:
                xq = xq.astype(jnp.bfloat16)
            w = w_ref[...]
            if w.dtype != jnp.bfloat16:
                w = w.astype(jnp.bfloat16)
            acc_ref[...] += jnp.dot(xq, w, preferred_element_type=jnp.float32)

        @pl.when(k == pl.num_programs(2) - 1)
        def _():
            sb = sb_ref[...]                       # (2, tn): [SCB/127 ; bias]
            acc = acc_ref[...].astype(jnp.float32)
            out = acc * (sx_ref[...] * sb[0:1, :]) + sb[1:2, :]
            out_ref[...] = out.astype(out_ref.dtype)

    return kernel


def linear8bitlt_forward(x, cb_t, scb, bias, *, tm=512, tn=512, tk=2048,
                         use_int8_mxu=None):
    """LLM.int8() (threshold=0) forward pass.

    x:     [B, S, K] float   activations
    cb_t:  [K, N]    int8    row-wise quantized weight, pre-transposed
    scb:   [N]       float32 per-output-feature absmax of the fp weight
    bias:  [N]       float   or None
    """
    B, S, K = x.shape
    N = cb_t.shape[1]
    M = B * S
    out_dtype = x.dtype
    out_bytes = jnp.dtype(out_dtype).itemsize
    x_bytes = jnp.dtype(x.dtype).itemsize

    kind = _device_kind()
    if use_int8_mxu is None:
        use_int8_mxu = _has_int8_mxu(kind)
    vmem_cap = _vmem_cap_bytes(kind)

    xq_dtype = jnp.int8 if use_int8_mxu else jnp.bfloat16
    # For compute-bound prefill without an int8 MXU, pre-cast the weight to
    # bf16 once at staging time; keep int8 in HBM for memory-bound decode.
    w_dtype = jnp.int8
    if (not use_int8_mxu) and M >= 1024:
        w_dtype = jnp.bfloat16
    xq_bytes = jnp.dtype(xq_dtype).itemsize
    w_bytes = jnp.dtype(w_dtype).itemsize
    acc_dtype = jnp.int32 if use_int8_mxu else jnp.float32

    # ---- tile selection ----------------------------------------------------
    tm = min(tm, _round_up(M, 32))
    Kp = _round_up(K, 128)
    tk = _pick_divisor_tile(Kp, tk)
    tn = min(tn, _round_up(N, 128))

    def gemm_tile_bytes(tm_, tn_, tk_):
        inputs = (tm_ * tk_ * xq_bytes + tk_ * tn_ * w_bytes
                  + tm_ * 4 + 2 * tn_ * 4)
        # double-buffered inputs/output + accumulator + f32 epilogue temp
        return (2 * inputs + 2 * tm_ * tn_ * out_bytes
                + tm_ * tn_ * 4 + tm_ * tn_ * 4)

    budget = min(40 * _MiB, vmem_cap)
    while gemm_tile_bytes(tm, tn, tk) > budget:
        if tk > 512 and (tk // 2) % 128 == 0:
            tk //= 2
        elif tn > 256 and (tn // 2) % 128 == 0:
            tn //= 2
        elif tm > 256 and (tm // 2) % 32 == 0:
            tm //= 2
        else:
            break

    # v7x has two TensorCores per chip: for decode-like shapes (single i
    # block) keep at least 2 "parallel" j blocks so neither core idles.
    if "v7" in kind and M <= tm:
        while N <= tn and tn >= 256 and (tn // 2) % 128 == 0:
            tn //= 2

    Mp = _round_up(M, tm)
    Np = _round_up(N, tn)

    # ---- operand staging (no f32 upcast of x; pad only where required) ----
    x2d = x.reshape(M, K)
    if Mp != M or Kp != K:
        x2d = jnp.pad(x2d, ((0, Mp - M), (0, Kp - K)))
    w = cb_t
    if Kp != K or Np != N:
        w = jnp.pad(w, ((0, Kp - K), (0, Np - N)))
    if w.dtype != w_dtype:
        w = w.astype(w_dtype)
    # Fused per-feature scale (SCB/127) + bias -> single (2, Np) f32 operand.
    sb = jnp.zeros((2, Np), jnp.float32)
    sb = sb.at[0, :N].set(scb.astype(jnp.float32) * (1.0 / 127.0))
    if bias is not None:
        sb = sb.at[1, :N].set(bias.astype(jnp.float32))

    # ---- pre-pass: per-token quantization ----------------------------------
    # Row-block size decoupled from the GEMM tm: derived from K and a VMEM
    # budget so the (rows, Kp) tiles stay pipelined on every generation.
    pre_per_row = 2 * Kp * (x_bytes + xq_bytes) + 4 * Kp + 2 * 4
    pre_rows = tm
    while pre_rows > 8 and pre_rows % 2 == 0 and pre_rows * pre_per_row > 24 * _MiB:
        pre_rows //= 2
    pre_vmem = int(min(vmem_cap,
                       max(32 * _MiB, pre_rows * pre_per_row + 8 * _MiB)))
    xq, sx = _quantize_activations(x2d, pre_rows, xq_dtype, pre_vmem)
    # TODO(synk): for HBM-bound decode with few N-tiles, fuse the quantization
    # into the GEMM to skip the xq HBM round-trip entirely.

    # ---- main GEMM ----------------------------------------------------------
    gemm_vmem = int(min(vmem_cap,
                        max(32 * _MiB, gemm_tile_bytes(tm, tn, tk) + 8 * _MiB)))
    cost = pl.CostEstimate(
        flops=2 * Mp * Np * Kp,
        transcendentals=0,
        bytes_accessed=(Mp * Kp * xq_bytes + Kp * Np * w_bytes
                        + Mp * Np * out_bytes + Mp * 4 + 2 * Np * 4),
    )

    out_p = pl.pallas_call(
        _make_int8_gemm_kernel(use_int8_mxu),
        out_shape=jax.ShapeDtypeStruct((Mp, Np), out_dtype),
        grid_spec=pltpu.PrefetchScalarGridSpec(
            num_scalar_prefetch=0,
            grid=(Mp // tm, Np // tn, Kp // tk),
            in_specs=[
                pl.BlockSpec((tm, tk), lambda i, j, k: (i, k)),   # Cx
                # TODO(synk): pipeline_mode=pl.Buffered(3) on this weight spec
                # for weight-bandwidth-bound decode shapes.
                pl.BlockSpec((tk, tn), lambda i, j, k: (k, j)),   # CB^T
                pl.BlockSpec((tm, 1), lambda i, j, k: (i, 0)),    # absmax_x/127
                pl.BlockSpec((2, tn), lambda i, j, k: (0, j)),    # [SCB/127;bias]
            ],
            out_specs=pl.BlockSpec((tm, tn), lambda i, j, k: (i, j)),
            scratch_shapes=[pltpu.VMEM((tm, tn), acc_dtype)],
        ),
        compiler_params=pltpu.CompilerParams(
            dimension_semantics=("parallel", "parallel", "arbitrary"),
            vmem_limit_bytes=gemm_vmem,
        ),
        cost_estimate=cost,
    )(xq, w, sx, sb)

    return out_p[:M, :N].reshape(B, S, N)


def quantize_weight_rowwise(w):
    """Int8Params-style row-wise quantization + pre-transpose (setup time).

    w: [N, K] float (PyTorch nn.Linear layout). Returns:
      cb_t [K, N] int8   -- quantized weight, transposed for a lane-dense RHS
      scb  [N]   float32 -- per-output-feature absmax
    """
    w = w.astype(jnp.float32)
    scb = jnp.max(jnp.abs(w), axis=-1)                           # (N,)
    scb_safe = jnp.where(scb == 0.0, 1.0, scb)
    cb = jnp.clip(jnp.round(w * (127.0 / scb_safe[:, None])),
                  -127.0, 127.0).astype(jnp.int8)                # (N, K)
    return cb.T, scb


if __name__ == "__main__":
    key = jax.random.PRNGKey(0)
    k_x, k_w, k_b = jax.random.split(key, 3)

    B, S = 2, 8           # batch, sequence
    K, N = 32, 32         # in_features, out_features

    x = jax.random.normal(k_x, (B, S, K), dtype=jnp.float32)
    weight = jax.random.normal(k_w, (N, K), dtype=jnp.float32) * 0.05
    bias = jax.random.normal(k_b, (N,), dtype=jnp.float32) * 0.1

    # Parameter setup (Int8Params / init_8bit_state equivalent).
    cb_t, scb = quantize_weight_rowwise(weight)

    out = linear8bitlt_forward(x, cb_t, scb, bias)
    out = jax.block_until_ready(out)

    # Pure-JAX reference of the same int8 quantized-matmul semantics.
    absmax_x = jnp.max(jnp.abs(x), axis=-1, keepdims=True)
    absmax_x = jnp.where(absmax_x == 0.0, 1.0, absmax_x)
    xq_ref = jnp.clip(jnp.round(x * (127.0 / absmax_x)), -127.0, 127.0)
    ref = (jnp.einsum("bsk,kn->bsn", xq_ref, cb_t.astype(jnp.float32))
           * (absmax_x * (1.0 / 127.0))
           * (scb * (1.0 / 127.0))[None, None, :]
           + bias[None, None, :])

    assert out.shape == (B, S, N) and out.dtype == x.dtype
    assert jnp.allclose(out, ref, atol=1e-3, rtol=1e-3)
    print("KERNEL_OK")
</pallas_src>

<mosaic_0001>
module attributes {stable_mosaic.version = 11 : i64} {
  func.func @_quantize_act_kernel(%arg0: i32, %arg1: memref<32x128xf32, #tpu.memory_space<vmem>>, %arg2: memref<32x128xbf16, #tpu.memory_space<vmem>>, %arg3: memref<32x1xf32, #tpu.memory_space<vmem>>) attributes {dimension_semantics = [#tpu.dimension_semantics<parallel>], iteration_bounds = array<i64: 1>, scalar_prefetch = 0 : i64, scratch_operands = 0 : i64, tpu.core_type = #tpu.core_type<tc>, window_params = [{transform_indices = @transform_0, window_bounds = array<i64: 32, 128>}, {transform_indices = @transform_1, window_bounds = array<i64: 32, 128>}, {transform_indices = @transform_2, window_bounds = array<i64: 32, 1>}]} {
    %c0 = arith.constant 0 : index
    %c0_0 = arith.constant 0 : index
    %0 = vector.load %arg1[%c0, %c0_0] : memref<32x128xf32, #tpu.memory_space<vmem>>, vector<32x128xf32>
    %1 = math.absf %0 : vector<32x128xf32>
    %cst = arith.constant dense<0xFF800000> : vector<32xf32>
    %2 = vector.multi_reduction <maximumf>, %1, %cst [1] : vector<32x128xf32> to vector<32xf32>
    %3 = vector.shape_cast %2 : vector<32xf32> to vector<32x1xf32>
    %cst_1 = arith.constant 0.000000e+00 : f32
    %4 = vector.broadcast %cst_1 : f32 to vector<32x1xf32>
    %5 = arith.cmpf oeq, %3, %4 : vector<32x1xf32>
    %cst_2 = arith.constant 1.000000e+00 : f32
    %6 = vector.broadcast %cst_2 : f32 to vector<32x1xf32>
    %7 = arith.select %5, %6, %3 : vector<32x1xi1>, vector<32x1xf32>
    %cst_3 = arith.constant 1.270000e+02 : f32
    %8 = vector.broadcast %cst_3 : f32 to vector<32x1xf32>
    %9 = arith.divf %8, %7 : vector<32x1xf32>
    %10 = vector.broadcast %9 : vector<32x1xf32> to vector<32x128xf32>
    %11 = arith.mulf %0, %10 : vector<32x128xf32>
    %12 = math.roundeven %11 : vector<32x128xf32>
    %cst_4 = arith.constant -1.270000e+02 : f32
    %cst_5 = arith.constant 1.270000e+02 : f32
    %13 = vector.broadcast %cst_4 : f32 to vector<32x128xf32>
    %14 = arith.maximumf %13, %12 : vector<32x128xf32>
    %15 = vector.broadcast %cst_5 : f32 to vector<32x128xf32>
    %16 = arith.minimumf %15, %14 : vector<32x128xf32>
    %17 = arith.truncf %16 : vector<32x128xf32> to vector<32x128xbf16>
    %c0_6 = arith.constant 0 : index
    %c0_7 = arith.constant 0 : index
    %18 = vector.load %arg2[%c0_6, %c0_7] : memref<32x128xbf16, #tpu.memory_space<vmem>>, vector<32x128xbf16>
    tpu.vector_store %arg2[%c0_6, %c0_7], %17 {strides = array<i32>} : memref<32x128xbf16, #tpu.memory_space<vmem>>, vector<32x128xbf16>,
    %cst_8 = arith.constant 0.00787401571 : f32
    %19 = vector.broadcast %cst_8 : f32 to vector<32x1xf32>
    %20 = arith.mulf %7, %19 : vector<32x1xf32>
    %c0_9 = arith.constant 0 : index
    %c0_10 = arith.constant 0 : index
    %21 = vector.load %arg3[%c0_9, %c0_10] : memref<32x1xf32, #tpu.memory_space<vmem>>, vector<32x1xf32>
    tpu.vector_store %arg3[%c0_9, %c0_10], %20 {strides = array<i32>} : memref<32x1xf32, #tpu.memory_space<vmem>>, vector<32x1xf32>,
    return
  }
  func.func @transform_0(%arg0: i32) -> (i32, i32) {
    %c0_i32 = arith.constant 0 : i32
    %c0_i32_0 = arith.constant 0 : i32
    return %arg0, %c0_i32 : i32, i32
  }
  func.func @transform_1(%arg0: i32) -> (i32, i32) {
    %c0_i32 = arith.constant 0 : i32
    %c0_i32_0 = arith.constant 0 : i32
    return %arg0, %c0_i32 : i32, i32
  }
  func.func @transform_2(%arg0: i32) -> (i32, i32) {
    %c0_i32 = arith.constant 0 : i32
    %c0_i32_0 = arith.constant 0 : i32
    return %arg0, %c0_i32 : i32, i32
  }
}

</mosaic_0001>

<bundles_post_ra>
// kernel: tpu_custom_call.1
= control target key start
LH: loop header
LB: loop body
LE: loop exit
PB: predicated region body
PF: predicated region fallthrough
CT: control target
= control target key end

     0   :  { %8 = vsyncpa [#allocation3], 0  ;;  %s273_s0 = inlined_call_operand.hbm [shape: f32[32,128], index: 0, kind: input, shape index: {}]   ;;  %s274_s1 = inlined_call_operand.hbm [shape: bf16[32,128], index: 1, kind: output, shape index: {0}]   ;;  %s275_s2 = inlined_call_operand.vmem [shape: f32[32,1], index: 2, kind: output, shape index: {1}]  }
   0x1   :  { %9 = vsyncpa [#allocation4], 0  ;;  %s212_s9 = smov [#allocation2]   ;;  %s164_s13 = scalar_lea.hbm %s273_s0, 512 }
   0x2   :  { %s15_s10 = sshll.u32 %s212_s9, 4  ;;  %p165_p0 = scmp.ne.s32.totalorder %s273_s0, %s164_s13  ;;  %s16_s10 = int_to_ptr.vmem [resolvable:$true] %s15_s10 }
   0x3   :  { %p168_p1 = scmp.lt.u32.totalorder %s164_s13, %s273_s0 }
   0x5   :  { %p170_p2 = pnand %p168_p1, %p165_p0 }
   0x7   :  { %173 = shalt.err (!%p170_p2)
}
   0x8   :  { %s174_s18 = scalar_lea.vmem %s16_s10, 512  ;;  %p179_p4 = scmp.lt.s32.totalorder %s16_s10, %s16_s10 }
   0x9   :  { %p175_p3 = scmp.ne.s32.totalorder %s16_s10, %s174_s18  ;;  %p180_p5 = scmp.lt.s32.totalorder %s174_s18, %s174_s18 }
   0xb   :  { %p181_p6 = por %p180_p5, %p179_p4 }
   0xd   :  { %p182_p7 = pnand %p181_p6, %p175_p3 }
   0xf   :  { %185 = shalt.err (!%p182_p7)
}
  0x10   :  { %s213_s19 = smov 128   ;;  %s214_s20 = smov 8  }
  0x11   :  { %21 = dma.hbm_to_vmem [thread:$0]  %s273_s0, 512, %s16_s10, [#allocation3], %s213_s19, %s213_s19, %s214_s20  }
  0x12   :  { %208 = dma.done.wait [#allocation3], 512  }
  0x13   :  { %209 = vsyncadd [#allocation3], 4294966784  ;;  %v27_v0 = vld [vmem:[#allocation2 + $0x10] sm:$0xff]  ;;  %v25_v1 = vld [vmem:[#allocation2] sm:$0xff]  ;;  %vm97_vm2 = vcmask 7168   ;;  %s215_s30 = smov [#allocation5]  }
  0x14   :  { %v28_v2 = vld [vmem:[#allocation2 + $0x18] sm:$0xff]  ;;  %v31_v3 = vand.u32 2147483647, %v27_v0  ;;  %v29_v4 = vand.u32 2147483647, %v25_v1  ;;  %v26_v5 = vld [vmem:[#allocation2 + $0x8] sm:$0xff] }
  0x15   :  { %v32_v6 = vand.u32 2147483647, %v28_v2  ;;  %v30_v7 = vand.u32 2147483647, %v26_v5  ;;  %s107_s3 = sshll.u32 %s215_s30, 4  ;;  %s108_s3 = int_to_ptr.vmem [resolvable:$true] %s107_s3 }
  0x16   :  { %37 = vmax.xlane.f32.xlu1 %v31_v3  ;;  %33 = vmax.xlane.f32.xlu0 %v29_v4  ;;  %p191_p9 = scmp.lt.s32.totalorder %s108_s3, %s108_s3 }
  0x1a   :  { %39 = vmax.xlane.f32.xlu1 %v32_v6  ;;  %35 = vmax.xlane.f32.xlu0 %v30_v7 }
  0xa3   :  { %v38_v8 = vpop.xlane.xlu1 %37  ;;  %v34_v9 = vpop.xlane.xlu0 %33 }
  0xa4   :  { %vm43_vm0 = vcmp.eq.f32.partialorder %v38_v8, 0.0  ;;  %vm41_vm1 = vcmp.eq.f32.partialorder %v34_v9, 0.0 }
  0xa5   :  { %v47_v10 = vsel %vm43_vm0, 1.0, %v38_v8  ;;  %v45_v11 = vsel %vm41_vm1, 1.0, %v34_v9 }
  0xa6   :  { %156 = vrcp.f32 %v47_v10  ;;  %v95_v12 = vmul.f32 0.007874016, %v47_v10  ;;  %v93_v13 = vmul.f32 0.007874016, %v45_v11 }
  0xa7   :  { %158 = vrcp.f32 %v45_v11  ;;  %v40_v14 = vpop.xlane.xlu1 %39  ;;  %v36_v15 = vpop.xlane.xlu0 %35 }
  0xa8   :  { %100 = vst.msk [vmem:[%s275_s2 + $0x10] sm:$0xff] %vm97_vm2, %v95_v12  ;;  %98 = vst.msk [vmem:[%s275_s2] sm:$0xff] %vm97_vm2, %v93_v13  ;;  %vm44_vm3 = vcmp.eq.f32.partialorder %v40_v14, 0.0  ;;  %vm42_vm4 = vcmp.eq.f32.partialorder %v36_v15, 0.0 }
  0xa9   :  { %v48_v16 = vsel %vm44_vm3, 1.0, %v40_v14  ;;  %v46_v17 = vsel %vm42_vm4, 1.0, %v36_v15 }
  0xaa   :  { %160 = vrcp.f32 %v48_v16  ;;  %v96_v18 = vmul.f32 0.007874016, %v48_v16  ;;  %v94_v19 = vmul.f32 0.007874016, %v46_v17 }
  0xab   :  { %162 = vrcp.f32 %v46_v17 }
  0xac   :  { %101 = vst.msk [vmem:[%s275_s2 + $0x18] sm:$0xff] %vm97_vm2, %v96_v18  ;;  %99 = vst.msk [vmem:[%s275_s2 + $0x8] sm:$0xff] %vm97_vm2, %v94_v19  ;;  %s186_s2 = scalar_lea.vmem %s108_s3, 256 }
  0xad   :  { %p187_p8 = scmp.ne.s32.totalorder %s108_s3, %s186_s2  ;;  %p192_p10 = scmp.lt.s32.totalorder %s186_s2, %s186_s2 }
  0xaf   :  { %p193_p11 = por %p192_p10, %p191_p9 }
  0xb0   :  { %v157_v20 = vpop.eup %156 }
  0xb1   :  { %v159_v21 = vpop.eup %158  ;;  %v54_v22 = vmul.f32 127.0, %v157_v20  ;;  %p194_p12 = pnand %p193_p11, %p187_p8 }
  0xb2   :  { %v50_v23 = vmul.f32 127.0, %v159_v21 }
  0xb3   :  { %v59_v24 = vmul.f32 %v54_v22, %v27_v0 }
  0xb4   :  { %v161_v25 = vpop.eup %160  ;;  %v57_v26 = vmul.f32 %v50_v23, %v25_v1 }
  0xb5   :  { %v163_v27 = vpop.eup %162  ;;  %v56_v28 = vmul.f32 127.0, %v161_v25  ;;  %v148_v30 = vround.rtne.f32 %v59_v24 }
  0xb6   :  { %v52_v29 = vmul.f32 127.0, %v163_v27  ;;  %v146_v32 = vround.rtne.f32 %v57_v26 }
  0xb7   :  { %v60_v31 = vmul.f32 %v56_v28, %v28_v2  ;;  %v125_v36 = vclamps-f32 %v148_v30, 127.0 }
  0xb8   :  { %v58_v33 = vmul.f32 %v52_v29, %v26_v5  ;;  %v123_v38 = vclamps-f32 %v146_v32, 127.0 }
  0xb9   :  { %v149_v34 = vround.rtne.f32 %v60_v31 }
  0xba   :  { %v147_v35 = vround.rtne.f32 %v58_v33 }
  0xbb   :  { %v126_v37 = vclamps-f32 %v149_v34, 127.0 }
  0xbc   :  { %v124_v39 = vclamps-f32 %v147_v35, 127.0 }
  0xbd   :  { %v143_v40 = vpack.c.bf16 %v126_v37, %v125_v36 }
  0xbe   :  { %v138_v41 = vpack.c.bf16 %v124_v39, %v123_v38 }
  0xbf   :  { %145 = vst [vmem:[#allocation5 + $0x8] sm:$0xff] %v143_v40  }
  0xc0   :  { %139 = vst [vmem:[#allocation5] sm:$0xff] %v138_v41  }
  0xc1   :  { %197 = shalt.err (!%p194_p12)
}
  0xc2   :  { %s198_s6 = scalar_lea.hbm %s274_s1, 256 }
  0xc3   :  { %p199_p13 = scmp.ne.s32.totalorder %s274_s1, %s198_s6  ;;  %p202_p0 = scmp.lt.u32.totalorder %s198_s6, %s274_s1 }
  0xc5   :  { %p204_p1 = pnand %p202_p0, %p199_p13 }
  0xc7   :  { %207 = shalt.err (!%p204_p1)
}
  0xc8   :  { %s216_s11 = smov 64   ;;  %s217_s12 = smov 4  }
  0xc9   :  { %113 = dma.vmem_to_hbm [thread:$0]  %s108_s3, 256, %s274_s1, [#allocation4], %s216_s11, %s216_s11, %s217_s12  }
  0xca   :  { %210 = dma.done.wait [#allocation4], 256  }
  0xcb   :  { %211 = vsyncadd [#allocation4], 4294967040 }
  0xcc   :  { %121 = vsyncpa [#allocation3], 1 }
  0xcd   :  { %122 = vsyncpa [#allocation4], 1 }

</bundles_post_ra>
